<compile_context>
chip_gen: v6e
topology: v6e:2x2x1
jax: 0.10.0
libtpu: 0.0.40
codegen_flags: <defaults>
</compile_context>

<pallas_src>
import functools

import jax
import jax.numpy as jnp
from jax import lax
from jax.experimental import pallas as pl
from jax.experimental.pallas import tpu as pltpu


def _reg_loss_kernel(feat_ref, ind_ref, mask_ref, tgt_ref, out_ref, pred_acc,
                     *, inner_chunk):
    # feat_ref : (1, C, T_outer) native dtype -- current HW block of NCHW feats
    # ind_ref  : (1, 1, K) i32   -- global flat-spatial indices
    # mask_ref : (1, 1, K) f32
    # tgt_ref  : (1, C, K) f32   -- target, channel-major (K on lane axis)
    # out_ref  : (1, 1, C) f32   -- per-batch un-normalized loss (written once)
    # pred_acc : (C, K)     f32  -- gathered-pred accumulator (persists over h)
    h = pl.program_id(1)
    nh = pl.num_programs(1)

    C = feat_ref.shape[1]
    T_outer = feat_ref.shape[2]
    K = ind_ref.shape[2]
    T = inner_chunk
    n_inner = T_outer // T
    fdt = feat_ref.dtype

    @pl.when(h == 0)
    def _init():
        pred_acc[...] = jnp.zeros_like(pred_acc)

    ind = ind_ref[0]                                  # (1, K) i32
    block_off = h * T_outer                           # global offset of this block

    def chunk_dot(c, acc):
        start = c * T
        if T % 128 == 0 and not isinstance(start, int):
            start = pl.multiple_of(start, 128)
        feat_c = feat_ref[0, :, pl.ds(start, T)]      # (C, T), native dtype
        # One-hot^T for this chunk: (T, K), K lane-dense. 0/1 entries are exact
        # in any float dtype, so the MXU gather is exact.
        iota_hw = lax.broadcasted_iota(jnp.int32, (T, K), 0)
        onehot_t = (iota_hw == (ind - (block_off + c * T))).astype(fdt)
        return acc + jnp.dot(feat_c, onehot_t,
                             preferred_element_type=jnp.float32)

    acc0 = jnp.zeros((C, K), jnp.float32)
    if n_inner == 1:
        acc = chunk_dot(0, acc0)
    else:
        acc = lax.fori_loop(0, n_inner, chunk_dot, acc0,
                            unroll=min(n_inner, 8))
    pred_acc[...] += acc

    @pl.when(h == nh - 1)
    def _finalize():
        mask = mask_ref[0]                            # (1, K), broadcast over C
        tgt = tgt_ref[0]                              # (C, K)
        diff = jnp.abs((pred_acc[...] - tgt) * mask)  # fused mask multiply
        out_ref[...] = jnp.sum(diff, axis=1)[None, None, :]


def _pick_outer_block(hw, c, itemsize, budget_bytes=8 << 20):
    """Whole HW if the double-buffered feat slab fits the budget, else the
    largest multiple-of-128 divisor of HW whose slab does."""
    if 2 * c * hw * itemsize <= budget_bytes:
        return hw
    t = (budget_bytes // (2 * c * itemsize)) // 128 * 128
    t = min(t, (hw // 128) * 128)
    while t >= 128:
        if hw % t == 0:
            return int(t)
        t -= 128
    return hw


def _pick_inner_chunk(t_outer, max_chunk=2048):
    """Multiple-of-128 divisor of t_outer; bounds the (T, K) one-hot temp."""
    if t_outer <= max_chunk:
        return t_outer
    c = (max_chunk // 128) * 128
    while c >= 128:
        if t_outer % c == 0:
            return c
        c -= 128
    return t_outer


def reg_loss(output, mask, ind, target, *, hw_block=None, inner_chunk=None):
    """output: (B, C, H, W), mask: (B, K), ind: (B, K) int, target: (B, K, C).
    Returns per-channel loss (C,) matching PyTorch RegLoss.forward."""
    B, C, H, W = output.shape
    K = ind.shape[1]
    HW = H * W

    # Free reshape of NCHW, kept in the source dtype (no extra HBM pass).
    feat = output.reshape(B, C, HW)                                   # (B, C, HW)
    itemsize = jnp.dtype(feat.dtype).itemsize

    T_outer = hw_block if hw_block is not None else _pick_outer_block(HW, C, itemsize)
    assert HW % T_outer == 0, f"HW block {T_outer} must divide HW={HW}"
    T_inner = inner_chunk if inner_chunk is not None else _pick_inner_chunk(T_outer)
    assert T_outer % T_inner == 0, f"inner chunk {T_inner} must divide {T_outer}"

    ind_row = ind.astype(jnp.int32).reshape(B, 1, K)                  # (B, 1, K)
    mask_row = mask.astype(jnp.float32).reshape(B, 1, K)              # (B, 1, K)
    tgt_t = jnp.transpose(target.astype(jnp.float32), (0, 2, 1))      # (B, C, K), tiny

    # Explicit VMEM budget: double-buffered feat block + accumulator +
    # one-hot / iota temporaries + headroom. Keeps the 2-deep pipeline intact
    # on v5e (16 MiB default scoped) and v7x (32 MiB default / 64 MiB phys).
    needed = (2 * C * T_outer * itemsize + C * K * 4
              + 2 * T_inner * K * 4 + (4 << 20))
    vmem_limit = int(min(48 << 20, max(32 << 20, needed)))

    kernel = functools.partial(_reg_loss_kernel, inner_chunk=T_inner)

    partials = pl.pallas_call(
        kernel,
        out_shape=jax.ShapeDtypeStruct((B, 1, C), jnp.float32),
        grid_spec=pltpu.PrefetchScalarGridSpec(
            num_scalar_prefetch=0,
            grid=(B, HW // T_outer),                 # reduction (HW) axis last
            in_specs=[
                pl.BlockSpec((1, C, T_outer), lambda b, h: (b, 0, h)),
                pl.BlockSpec((1, 1, K), lambda b, h: (b, 0, 0)),
                pl.BlockSpec((1, 1, K), lambda b, h: (b, 0, 0)),
                pl.BlockSpec((1, C, K), lambda b, h: (b, 0, 0)),
            ],
            out_specs=pl.BlockSpec((1, 1, C), lambda b, h: (b, 0, 0)),
            scratch_shapes=[pltpu.VMEM((C, K), jnp.float32)],
        ),
        compiler_params=pltpu.CompilerParams(
            dimension_semantics=("parallel", "arbitrary"),
            vmem_limit_bytes=vmem_limit),
    )(feat, ind_row, mask_row, tgt_t)

    # Normalization and final batch reduction in the wrapper (tiny).
    msum = jnp.sum(mask.astype(jnp.float32))
    return jnp.sum(partials[:, 0, :], axis=0) / (msum + 1e-4)


def reg_loss_ref(output, mask, ind, target):
    """Pure-JAX reference mirroring the PyTorch forward (computed in f32)."""
    B, C, H, W = output.shape
    K = ind.shape[1]
    feat = jnp.transpose(output.astype(jnp.float32), (0, 2, 3, 1)).reshape(B, H * W, C)
    idx = jnp.broadcast_to(ind.astype(jnp.int32)[:, :, None], (B, K, C))
    pred = jnp.take_along_axis(feat, idx, axis=1)                     # (B, K, C)
    m = mask.astype(jnp.float32)[:, :, None]                          # (B, K, 1)
    t = target.astype(jnp.float32)
    loss = jnp.abs(pred * m - t * m)                                  # (B, K, C)
    loss = loss / (jnp.sum(m) + 0.0001)
    return jnp.sum(loss, axis=(0, 1))                                 # (C,)


if __name__ == "__main__":
    key = jax.random.PRNGKey(0)
    k0, k1, k2, k3 = jax.random.split(key, 4)

    # Small shapes consistent with the module.
    B, C, H, W, K = 2, 4, 16, 16, 8
    output = jax.random.normal(k0, (B, C, H, W), dtype=jnp.float32)
    target = jax.random.normal(k1, (B, K, C), dtype=jnp.float32)
    ind = jax.random.randint(k2, (B, K), 0, H * W, dtype=jnp.int32)
    mask = (jax.random.uniform(k3, (B, K)) > 0.3).astype(jnp.float32)

    loss = jax.block_until_ready(reg_loss(output, mask, ind, target))
    ref = jax.block_until_ready(reg_loss_ref(output, mask, ind, target))
    assert loss.shape == (C,)
    assert jnp.allclose(loss, ref, atol=1e-5, rtol=1e-5), (loss, ref)

    # Exercise the multi-block outer reduction + multi-chunk inner loop path.
    H2 = W2 = 32
    out2 = jax.random.normal(k0, (B, C, H2, W2), dtype=jnp.float32)
    ind2 = jax.random.randint(k2, (B, K), 0, H2 * W2, dtype=jnp.int32)
    loss2 = jax.block_until_ready(
        reg_loss(out2, mask, ind2, target, hw_block=512, inner_chunk=128))
    ref2 = jax.block_until_ready(reg_loss_ref(out2, mask, ind2, target))
    assert jnp.allclose(loss2, ref2, atol=1e-5, rtol=1e-5), (loss2, ref2)

    # Native bf16 feature streaming (no wrapper upcast): the 0/1 one-hot keeps
    # the gather exact, so the f32 reference on the bf16 values must match.
    out3 = out2.astype(jnp.bfloat16)
    loss3 = jax.block_until_ready(reg_loss(out3, mask, ind2, target))
    ref3 = jax.block_until_ready(reg_loss_ref(out3, mask, ind2, target))
    assert jnp.allclose(loss3, ref3, atol=1e-5, rtol=1e-5), (loss3, ref3)

    print("KERNEL_OK")
</pallas_src>

<mosaic_0001>
module attributes {stable_mosaic.version = 11 : i64} {
  func.func @_reg_loss_kernel(%arg0: i32, %arg1: i32, %arg2: memref<1x4x256xf32, #tpu.memory_space<vmem>>, %arg3: memref<1x1x8xi32, #tpu.memory_space<vmem>>, %arg4: memref<1x1x8xf32, #tpu.memory_space<vmem>>, %arg5: memref<1x4x8xf32, #tpu.memory_space<vmem>>, %arg6: memref<1x1x4xf32, #tpu.memory_space<vmem>>, %arg7: memref<4x8xf32, #tpu.memory_space<vmem>>) attributes {dimension_semantics = [#tpu.dimension_semantics<parallel>, #tpu.dimension_semantics<arbitrary>], iteration_bounds = array<i64: 2, 1>, scalar_prefetch = 0 : i64, scratch_operands = 1 : i64, tpu.core_type = #tpu.core_type<tc>, window_params = [{transform_indices = @transform_0, window_bounds = array<i64: 1, 4, 256>}, {transform_indices = @transform_1, window_bounds = array<i64: 1, 1, 8>}, {transform_indices = @transform_2, window_bounds = array<i64: 1, 1, 8>}, {transform_indices = @transform_3, window_bounds = array<i64: 1, 4, 8>}, {transform_indices = @transform_4, window_bounds = array<i64: 1, 1, 4>}]} {
    %c0_i32 = arith.constant 0 : i32
    %0 = arith.cmpi eq, %arg1, %c0_i32 : i32
    %1 = arith.extui %0 : i1 to i32
    %c0_i32_0 = arith.constant 0 : i32
    %2 = arith.cmpi ne, %1, %c0_i32_0 : i32
    scf.if %2 {
      %cst_14 = arith.constant 0.000000e+00 : f32
      %25 = vector.broadcast %cst_14 : f32 to vector<4x8xf32>
      %c0_15 = arith.constant 0 : index
      %c0_16 = arith.constant 0 : index
      %26 = vector.load %arg7[%c0_15, %c0_16] : memref<4x8xf32, #tpu.memory_space<vmem>>, vector<4x8xf32>
      tpu.vector_store %arg7[%c0_15, %c0_16], %25 {strides = array<i32>} : memref<4x8xf32, #tpu.memory_space<vmem>>, vector<4x8xf32>,
    } else {
    }
    %c0 = arith.constant 0 : index
    %c0_1 = arith.constant 0 : index
    %c0_2 = arith.constant 0 : index
    %3 = vector.load %arg3[%c0, %c0_1, %c0_2] : memref<1x1x8xi32, #tpu.memory_space<vmem>>, vector<1x1x8xi32>
    %4 = vector.shape_cast %3 : vector<1x1x8xi32> to vector<1x8xi32>
    %c256_i32 = arith.constant 256 : i32
    %5 = arith.muli %arg1, %c256_i32 : i32
    %cst = arith.constant 0.000000e+00 : f32
    %6 = vector.broadcast %cst : f32 to vector<4x8xf32>
    %c0_3 = arith.constant 0 : index
    %c0_4 = arith.constant 0 : index
    %c0_5 = arith.constant 0 : index
    %7 = vector.load %arg2[%c0_3, %c0_4, %c0_5] : memref<1x4x256xf32, #tpu.memory_space<vmem>>, vector<1x4x256xf32>
    %8 = vector.shape_cast %7 : vector<1x4x256xf32> to vector<4x256xf32>
    %9 = tpu.iota {dimensions = array<i32: 0>} : vector<256x8xi32>
    %c0_i32_6 = arith.constant 0 : i32
    %10 = arith.addi %5, %c0_i32_6 : i32
    %11 = vector.broadcast %10 : i32 to vector<1x8xi32>
    %12 = arith.subi %4, %11 : vector<1x8xi32>
    %13 = vector.broadcast %12 : vector<1x8xi32> to vector<256x8xi32>
    %14 = arith.cmpi eq, %9, %13 : vector<256x8xi32>
    %15 = arith.extui %14 : vector<256x8xi1> to vector<256x8xi32>
    %16 = arith.sitofp %15 : vector<256x8xi32> to vector<256x8xf32>
    %cst_7 = arith.constant dense<0.000000e+00> : vector<4x8xf32>
    %17 = tpu.matmul %8, %16, %cst_7 {dimension_numbers = #tpu.dot_dimension_numbers<[1], [0], [0], [1], [0, 0, 1, 1], [], []>} : vector<4x256xf32>, vector<256x8xf32>, vector<4x8xf32> -> vector<4x8xf32>
    %18 = arith.addf %6, %17 : vector<4x8xf32>
    %c0_8 = arith.constant 0 : index
    %c0_9 = arith.constant 0 : index
    %19 = vector.load %arg7[%c0_8, %c0_9] : memref<4x8xf32, #tpu.memory_space<vmem>>, vector<4x8xf32>
    %20 = arith.addf %19, %18 : vector<4x8xf32>
    %c0_10 = arith.constant 0 : index
    %c0_11 = arith.constant 0 : index
    %21 = vector.load %arg7[%c0_10, %c0_11] : memref<4x8xf32, #tpu.memory_space<vmem>>, vector<4x8xf32>
    tpu.vector_store %arg7[%c0_10, %c0_11], %20 {strides = array<i32>} : memref<4x8xf32, #tpu.memory_space<vmem>>, vector<4x8xf32>,
    %c0_i32_12 = arith.constant 0 : i32
    %22 = arith.cmpi eq, %arg1, %c0_i32_12 : i32
    %23 = arith.extui %22 : i1 to i32
    %c0_i32_13 = arith.constant 0 : i32
    %24 = arith.cmpi ne, %23, %c0_i32_13 : i32
    scf.if %24 {
      %c0_14 = arith.constant 0 : index
      %c0_15 = arith.constant 0 : index
      %c0_16 = arith.constant 0 : index
      %25 = vector.load %arg4[%c0_14, %c0_15, %c0_16] : memref<1x1x8xf32, #tpu.memory_space<vmem>>, vector<1x1x8xf32>
      %26 = vector.shape_cast %25 : vector<1x1x8xf32> to vector<1x8xf32>
      %c0_17 = arith.constant 0 : index
      %c0_18 = arith.constant 0 : index
      %c0_19 = arith.constant 0 : index
      %27 = vector.load %arg5[%c0_17, %c0_18, %c0_19] : memref<1x4x8xf32, #tpu.memory_space<vmem>>, vector<1x4x8xf32>
      %28 = vector.shape_cast %27 : vector<1x4x8xf32> to vector<4x8xf32>
      %c0_20 = arith.constant 0 : index
      %c0_21 = arith.constant 0 : index
      %29 = vector.load %arg7[%c0_20, %c0_21] : memref<4x8xf32, #tpu.memory_space<vmem>>, vector<4x8xf32>
      %30 = arith.subf %29, %28 : vector<4x8xf32>
      %31 = vector.broadcast %26 : vector<1x8xf32> to vector<4x8xf32>
      %32 = arith.mulf %30, %31 : vector<4x8xf32>
      %33 = math.absf %32 : vector<4x8xf32>
      %cst_22 = arith.constant dense<0.000000e+00> : vector<4xf32>
      %34 = vector.multi_reduction <add>, %33, %cst_22 [1] : vector<4x8xf32> to vector<4xf32>
      %35 = vector.shape_cast %34 : vector<4xf32> to vector<1x1x4xf32>
      %c0_23 = arith.constant 0 : index
      %c0_24 = arith.constant 0 : index
      %c0_25 = arith.constant 0 : index
      %36 = vector.load %arg6[%c0_23, %c0_24, %c0_25] : memref<1x1x4xf32, #tpu.memory_space<vmem>>, vector<1x1x4xf32>
      tpu.vector_store %arg6[%c0_23, %c0_24, %c0_25], %35 {strides = array<i32>} : memref<1x1x4xf32, #tpu.memory_space<vmem>>, vector<1x1x4xf32>,
    } else {
    }
    return
  }
  func.func @transform_0(%arg0: i32, %arg1: i32) -> (i32, i32, i32) {
    %c0_i32 = arith.constant 0 : i32
    %c0_i32_0 = arith.constant 0 : i32
    return %arg0, %c0_i32, %arg1 : i32, i32, i32
  }
  func.func @transform_1(%arg0: i32, %arg1: i32) -> (i32, i32, i32) {
    %c0_i32 = arith.constant 0 : i32
    %c0_i32_0 = arith.constant 0 : i32
    %c0_i32_1 = arith.constant 0 : i32
    return %arg0, %c0_i32, %c0_i32_0 : i32, i32, i32
  }
  func.func @transform_2(%arg0: i32, %arg1: i32) -> (i32, i32, i32) {
    %c0_i32 = arith.constant 0 : i32
    %c0_i32_0 = arith.constant 0 : i32
    %c0_i32_1 = arith.constant 0 : i32
    return %arg0, %c0_i32, %c0_i32_0 : i32, i32, i32
  }
  func.func @transform_3(%arg0: i32, %arg1: i32) -> (i32, i32, i32) {
    %c0_i32 = arith.constant 0 : i32
    %c0_i32_0 = arith.constant 0 : i32
    %c0_i32_1 = arith.constant 0 : i32
    return %arg0, %c0_i32, %c0_i32_0 : i32, i32, i32
  }
  func.func @transform_4(%arg0: i32, %arg1: i32) -> (i32, i32, i32) {
    %c0_i32 = arith.constant 0 : i32
    %c0_i32_0 = arith.constant 0 : i32
    %c0_i32_1 = arith.constant 0 : i32
    return %arg0, %c0_i32, %c0_i32_0 : i32, i32, i32
  }
}

</mosaic_0001>

<bundles_post_ra>
// kernel: tpu_custom_call.1
= control target key start
LH: loop header
LB: loop body
LE: loop exit
PB: predicated region body
PF: predicated region fallthrough
CT: control target
= control target key end

     0   :  { %s1395_s0 = inlined_call_operand.hbm [shape: f32[2,4,256], index: 0, kind: input, shape index: {}]   ;;  %s1396_s1 = inlined_call_operand.hbm [shape: s32[2,1,8], index: 1, kind: input, shape index: {}]   ;;  %s1397_s2 = inlined_call_operand.vmem [shape: f32[2,1,8], index: 2, kind: input, shape index: {}]   ;;  %s1398_s3 = inlined_call_operand.hbm [shape: f32[2,4,8], index: 3, kind: input, shape index: {}]   ;;  %s1399_s4 = inlined_call_operand.hbm [shape: f32[2,1,4], index: 4, kind: output, shape index: {}]  }
   0x1   :  { %1401 = sst [smem:[#allocation15_spill]] %s1396_s1 }
   0x2   :  { %9 = vsyncpa [#allocation4], 0 }
   0x3   :  { %11 = vsyncpa [#allocation4 + $0x1], 0 }
   0x4   :  { %12 = vsyncpa [#allocation7], 0 }
   0x5   :  { %14 = vsyncpa [#allocation7 + $0x1], 0 }
   0x6   :  { %15 = vsyncpa [#allocation5], 0 }
   0x7   :  { %17 = vsyncpa [#allocation5 + $0x1], 0  ;;  %s1094_s15 = smov 0   ;;  %s1096_s16 = smov 0  }
   0x8   :  { %s1098_s17 = smov 0   ;;  %s1100_s18 = smov 0  }
   0x9   :  { %s1102_s19 = smov 0   ;;  %s1104_s20 = smov 0  }
   0xa LB: > { %s1125_s21 = sadd.s32 4294967295, %s1061_s20   ;;  %s701_s22 = sadd.s32 4294967294, %s1061_s20   ;;  %s1061_s20 = sphi %s1104_s20, %s23_s20   ;;  %s1057_s19 = sphi %s1102_s19, %s1418_s19   ;;  %s1053_s18 = sphi %s1100_s18, %s1417_s18   ;;  %s1049_s17 = sphi %s1098_s17, %s1416_s17   ;;  %s1045_s16 = sphi %s1096_s16, %s1415_s16   ;;  %s1041_s15 = sphi %s1094_s15, %s1414_s15  }
   0xb   : > { %s35_s23 = sadd.s32 1, %s1057_s19  ;;  %s44_s24 = sadd.s32 1, %s1049_s17 }
   0xc   : > { %p37_p0 = scmp.ge.s32.totalorder %s35_s23, 2  ;;  %p51_p1 = scmp.ne.s32.totalorder %s1049_s17, %s1045_s16 }
   0xd   : > { %p52_p2 = scmp.eq.s32.totalorder %s1061_s20, 0  ;;  %p57_p3 = scmp.ne.s32.totalorder %s1045_s16, %s1041_s15 }
   0xe   : > { %s1420_s23 = smov (%p37_p0, %s35_s23), 0  ;;  %p58_p5 = scmp.eq.s32.totalorder %s1125_s21, 0 }
   0xf   : > { %1402 = sst [smem:[#allocation13_spill]] %s1420_s23  ;;  %p1137_p4 = por %p52_p2, %p51_p1 }
  0x10   : > { %s39_s26 = ssub.s32 %s1057_s19, %s1420_s23  ;;  %p159_p6 = scmp.eq.s32.totalorder %s1125_s21, 1 }
  0x11   : > { %p42_p7 = scmp.eq.s32.totalorder %s39_s26, 0  ;;  %p1145_p8 = por %p58_p5, %p57_p3 }
  0x12   : > { %p1149_p9 = por %p159_p6, %p51_p1  ;;  %p165_p10 = scmp.eq.s32.totalorder %s701_s22, 1 }
  0x13   : > { %s1154_s29 = scalar_select %p42_p7, %s1049_s17, %s44_s24  }
  0x14   : > { %p1156_p11 = por %p165_p10, %p57_p3  ;;  %p840_p13 = scmp.lt.s32.totalorder %s1061_s20, 2 }
  0x15   : > { %1406 = sst [smem:[#allocation14_spill]] %s1154_s29  ;;  %s1163_s5 = sand.u32 1, %s1049_s17  }
  0x16   : > { %s206_s6 = sand.u32 1, %s1061_s20   ;;  %p1168_p0 = pnand %p840_p13, %p1137_p4 }
  0x17   : > { %s707_s8 = sshll.u32 %s1057_s19, 4  ;;  %s209_s9 = scalar_lea.vmem [#allocation6], %s1163_s5 }
  0x18   : > { %s216_s10 = sshll.u32 %s209_s9, 4  ;;  %s1409_s1 = sld [smem:[#allocation15_spill]]  ;;  %s217_s10 = int_to_ptr.vmem [resolvable:$true] %s216_s10 }
  0x19   : > { %p710_p1 = scmp.ge.s32.totalorder %s1061_s20, 1  ;;  %s1178_s14 = scalar_lea.sflag [#allocation7], %s206_s6 }
  0x1a   : > { %p895_p2 = pneg %p1168_p0  ;;  %s906_s22 = scalar_lea.vmem %s217_s10, 16 }
  0x1b   : > { %p907_p3 = scmp.ne.s32.totalorder %s217_s10, %s906_s22  ;;  %s1063_s24 = smov [#allocation6]  }
  0x1c   : > { %s911_s25 = sshll.u32 %s1063_s24, 4  ;;  %s912_s25 = int_to_ptr.vmem [resolvable:$false] %s911_s25 }
  0x1d   : > { %p909_p4 = pnand %p907_p3, %p895_p2  ;;  %s913_s26 = scalar_lea.vmem %s912_s25, 32 }
  0x1e   : > { %s214_s13 = scalar_lea.hbm %s1409_s1, %s707_s8  ;;  %p914_p6 = scmp.lt.s32.totalorder %s217_s10, %s912_s25 }
  0x1f   : > { %p910_p5 = pneg %p909_p4  ;;  %p915_p7 = scmp.lt.s32.totalorder %s913_s26, %s906_s22 }
  0x21   : > { %p916_p10 = por %p915_p7, %p914_p6 }
  0x23   : > { %p917_p13 = pnand %p916_p10, %p910_p5 }
  0x25   : > { %920 = shalt.err (!%p917_p13)
}
  0x26   : > { %832 = dma.hbm_to_vmem [thread:$0]  (!%p1168_p0), %s214_s13, 16, %s217_s10, %s1178_s14  }
  0x27   : > { %p245_p3 = scmp.lt.s32.totalorder %s1061_s20, 3  ;;  %s704_s8 = sshll.u32 %s1163_s5, 3 }
  0x28   : > { %s782_s9 = sshll.u32 %s1057_s19, 7  ;;  %s189_s24 = scalar_lea.vmem [#allocation3], %s704_s8 }
  0x29   : > { %p1191_p4 = pnand %p710_p1, %p245_p3  ;;  %s197_s22 = scalar_lea.hbm %s1395_s0, %s782_s9 }
  0x2a   : > { %s199_s25 = sshll.u32 %s189_s24, 4  ;;  %s708_s26 = sshll.u32 %s1163_s5, 2  ;;  %s200_s25 = int_to_ptr.vmem [resolvable:$true] %s199_s25 }
  0x2b   : > { %s186_s1 = scalar_lea.sflag [#allocation4], %s1163_s5  ;;  %s934_s23 = scalar_lea.vmem %s200_s25, 128 }
  0x2c   : > { %p935_p5 = scmp.ne.s32.totalorder %s200_s25, %s934_s23  ;;  %s1064_s10 = smov [#allocation3]  }
  0x2d   : > { %s939_s13 = sshll.u32 %s1064_s10, 4  ;;  %s940_s13 = int_to_ptr.vmem [resolvable:$false] %s939_s13 }
  0x2e   : > { %p937_p6 = pnand %p935_p5, %p895_p2  ;;  %s941_s29 = scalar_lea.vmem %s940_s13, 256 }
  0x2f   : > { %p942_p7 = scmp.lt.s32.totalorder %s200_s25, %s940_s13  ;;  %p943_p10 = scmp.lt.s32.totalorder %s941_s29, %s934_s23 }
  0x30   : > { %p938_p1 = pneg %p937_p6 }
  0x31   : > { %p944_p13 = por %p943_p10, %p942_p7 }
  0x33   : > { %p945_p3 = pnand %p944_p13, %p938_p1 }
  0x35   : > { %948 = shalt.err (!%p945_p3)
}
  0x36   : > { %829 = dma.hbm_to_vmem [thread:$0]  (!%p1168_p0), %s197_s22, 128, %s200_s25, %s186_s1  }
  0x37   : > { %s709_s5 = sshll.u32 %s1057_s19, 6  ;;  %s233_s12 = scalar_lea.vmem [#allocation8], %s708_s26 }
  0x38   : > { %s238_s11 = scalar_lea.hbm %s1398_s3, %s709_s5  ;;  %s240_s24 = sshll.u32 %s233_s12, 4  ;;  %s241_s24 = int_to_ptr.vmem [resolvable:$true] %s240_s24 }
  0x39   : > { %s962_s10 = scalar_lea.vmem %s241_s24, 64  ;;  %s1065_s23 = smov [#allocation8]  }
  0x3a   : > { %p963_p5 = scmp.ne.s32.totalorder %s241_s24, %s962_s10  ;;  %s967_s29 = sshll.u32 %s1065_s23, 4  ;;  %s968_s29 = int_to_ptr.vmem [resolvable:$false] %s967_s29 }
  0x3b   : > { %s969_s13 = scalar_lea.vmem %s968_s29, 128  ;;  %p970_p7 = scmp.lt.s32.totalorder %s241_s24, %s968_s29 }
  0x3c   : > { %p965_p6 = pnand %p963_p5, %p895_p2  ;;  %p971_p10 = scmp.lt.s32.totalorder %s969_s13, %s962_s10 }
  0x3e   : > { %p966_p1 = pneg %p965_p6  ;;  %p972_p13 = por %p971_p10, %p970_p7 }
  0x40   : > { %p973_p3 = pnand %p972_p13, %p966_p1 }
  0x42   : > { %976 = shalt.err (!%p973_p3)
}
  0x43   : > { %835 = dma.hbm_to_vmem [thread:$0]  (!%p1168_p0), %s238_s11, 64, %s241_s24, %s1178_s14  }
  0x44   : > { %249 = sbr.rel (%p1191_p4) target bundleno = 483 (0x1e3), region = 36  ;;  %s1220_s1 = sand.u32 (!%p1191_p4), 1, %s1045_s16  }
  0x45   : > { %s711_s22 = sshll.u32 (!%p1191_p4), %s1220_s1, 3  ;;  %s252_s25 = scalar_lea.sflag (!%p1191_p4), [#allocation4], %s1220_s1 }
  0x46   : > { %s1224_s26 = scalar_lea.vmem (!%p1191_p4), [#allocation3], %s711_s22 }
  0x49   : > { %1028 = dma.done.wait (%p1145_p8), %s252_s25, 128  }
  0x4a   : > { %1030 = vsyncadd (%p1145_p8), %s252_s25, 4294967168  ;;  %s260_s7 = sand.u32 1, %s1125_s21   ;;  %s263_s6 = scalar_lea.vmem [#allocation6], %s1220_s1 }
  0x4b   : > { %s261_s14 = scalar_lea.sflag [#allocation7], %s260_s7 }
  0x4c   : > { %1032 = dma.done.wait (%p1145_p8), %s261_s14, 80  }
  0x4d   : > { %1034 = vsyncadd (%p1145_p8), %s261_s14, 4294967216  ;;  %v321_v0 = vlaneseq  ;;  %v1244_v7 = vld [vmem:[%s263_s6] ss:$0 sm:$0xff]  ;;  %v1066_v10 = vmov 1.0   ;;  %v1276_v19 = vld [vmem:[%s1224_s26] sm:$0xff]  ;;  %v1067_v37 = vmov 0.0  }
  0x4e   : > { %v457_v23 = vcombine.high %v1276_v19, %v1276_v19  ;;  %p309_p8 = scmp.lt.s32.totalorder %s1053_s18, 1  ;;  %s712_s21 = sshll.u32 %s1220_s1, 2 }
  0x4f   : > { %v1237_v1 = vshrl.u32 %v321_v0, 7  ;;  %s272_s11 = scalar_lea.vmem [#allocation8], %s712_s21  ;;  %v553_v50 = vand.u32 127, %v321_v0  ;;  %s779_s12 = sshll.u32 %s1053_s18, 4 }
  0x50   : > { %523 = vmatprep.mubr.f32.mxu0 %v457_v23  ;;  %s310_s27 = scalar_select %p309_p8, %s1053_s18, 1  ;;  %v537_v43 = vld [vmem:[%s272_s11] sm:$0xf] }
  0x51   : > { %v353_v2 = vadd.s32 248, %v1237_v1  ;;  %v337_v3 = vadd.s32 120, %v1237_v1  ;;  %v352_v4 = vadd.s32 240, %v1237_v1  ;;  %v336_v5 = vadd.s32 112, %v1237_v1  ;;  %s307_s24 = scalar_lea.vmem [#allocation9], %s1220_s1  ;;  %s572_s13 = scalar_lea.hbm %s1399_s4, %s779_s12 }
  0x52   : > { %v351_v6 = vadd.s32 232, %v1237_v1  ;;  %v335_v8 = vadd.s32 104, %v1237_v1  ;;  %v350_v9 = vadd.s32 224, %v1237_v1  ;;  %v334_v11 = vadd.s32 96, %v1237_v1  ;;  %s311_s9 = scalar_lea.vmem %s1397_s2, %s310_s27  ;;  %s574_s10 = sshll.u32 %s307_s24, 4  ;;  %s575_s10 = int_to_ptr.vmem [resolvable:$true] %s574_s10 }
  0x53   : > { %vm391_vm0 = vcmp.eq.s32.totalorder %v353_v2, %v1244_v7  ;;  %vm375_vm1 = vcmp.eq.s32.totalorder %v337_v3, %v1244_v7  ;;  %vm390_vm2 = vcmp.eq.s32.totalorder %v352_v4, %v1244_v7  ;;  %vm374_vm3 = vcmp.eq.s32.totalorder %v336_v5, %v1244_v7  ;;  %v778_v44 = vld [vmem:[%s311_s9] ss:$0 sm:$0xff]  ;;  %s562_s22 = scalar_lea.sflag [#allocation5], %s1220_s1  ;;  %s977_s25 = scalar_lea.vmem %s575_s10, 16 }
  0x54   : > { %783 = vmatprep.subr.msk.mxu0 %vm391_vm0, %v1066_v10  ;;  %vm389_vm4 = vcmp.eq.s32.totalorder %v351_v6, %v1244_v7  ;;  %v349_v12 = vadd.s32 216, %v1237_v1  ;;  %vm373_vm5 = vcmp.eq.s32.totalorder %v335_v8, %v1244_v7  ;;  %v333_v13 = vadd.s32 88, %v1237_v1  ;;  %p978_p0 = scmp.ne.s32.totalorder %s575_s10, %s977_s25  ;;  %s1068_s26 = smov [#allocation9]  }
  0x55   : > { %784 = vmatpush3.msk.msra.mxu0 %vm375_vm1, %v1066_v10  ;;  %vm388_vm6 = vcmp.eq.s32.totalorder %v350_v9, %v1244_v7  ;;  %v348_v14 = vadd.s32 208, %v1237_v1  ;;  %vm372_vm7 = vcmp.eq.s32.totalorder %v334_v11, %v1244_v7  ;;  %v332_v15 = vadd.s32 80, %v1237_v1  ;;  %s981_s7 = sshll.u32 %s1068_s26, 4  ;;  %s982_s7 = int_to_ptr.vmem [resolvable:$false] %s981_s7 }
  0x56   : > { %785 = vmatprep.subr.msk.mxu0 %vm390_vm2, %v1066_v10  ;;  %vm387_vm8 = vcmp.eq.s32.totalorder %v349_v12, %v1244_v7  ;;  %v347_v16 = vadd.s32 200, %v1237_v1  ;;  %vm371_vm9 = vcmp.eq.s32.totalorder %v333_v13, %v1244_v7  ;;  %v331_v17 = vadd.s32 72, %v1237_v1  ;;  %p979_p2 = pnand %p978_p0, %p1149_p9  ;;  %s983_s18 = scalar_lea.vmem %s982_s7, 32 }
  0x57   : > { %786 = vmatpush3.msk.msra.mxu0 %vm374_vm3, %v1066_v10  ;;  %vm386_vm10 = vcmp.eq.s32.totalorder %v348_v14, %v1244_v7  ;;  %v346_v18 = vadd.s32 192, %v1237_v1  ;;  %vm370_vm11 = vcmp.eq.s32.totalorder %v332_v15, %v1244_v7  ;;  %v330_v20 = vadd.s32 64, %v1237_v1  ;;  %p984_p5 = scmp.lt.s32.totalorder %s575_s10, %s982_s7  ;;  %p985_p6 = scmp.lt.s32.totalorder %s983_s18, %s977_s25 }
  0x58   : > { %787 = vmatprep.subr.msk.mxu0 %vm389_vm4, %v1066_v10  ;;  %vm385_vm12 = vcmp.eq.s32.totalorder %v347_v16, %v1244_v7  ;;  %v345_v21 = vadd.s32 184, %v1237_v1  ;;  %vm369_vm13 = vcmp.eq.s32.totalorder %v331_v17, %v1244_v7  ;;  %v329_v22 = vadd.s32 56, %v1237_v1  ;;  %p980_p4 = pneg %p979_p2 }
  0x59   : > { %788 = vmatpush3.msk.msra.mxu0 %vm373_vm5, %v1066_v10  ;;  %vm384_vm14 = vcmp.eq.s32.totalorder %v346_v18, %v1244_v7  ;;  %v344_v24 = vadd.s32 176, %v1237_v1  ;;  %vm368_vm15 = vcmp.eq.s32.totalorder %v330_v20, %v1244_v7  ;;  %v328_v25 = vadd.s32 48, %v1237_v1  ;;  %p986_p1 = por %p985_p6, %p984_p5 }
  0x5a   : > { %789 = vmatprep.subr.msk.mxu0 %vm388_vm6, %v1066_v10  ;;  %vm383_vm0 = vcmp.eq.s32.totalorder %v345_v21, %v1244_v7  ;;  %v343_v26 = vadd.s32 168, %v1237_v1  ;;  %vm367_vm1 = vcmp.eq.s32.totalorder %v329_v22, %v1244_v7  ;;  %v327_v27 = vadd.s32 40, %v1237_v1 }
  0x5b   : > { %790 = vmatpush3.msk.msra.mxu0 %vm372_vm7, %v1066_v10  ;;  %vm382_vm2 = vcmp.eq.s32.totalorder %v344_v24, %v1244_v7  ;;  %v342_v28 = vadd.s32 160, %v1237_v1  ;;  %vm366_vm3 = vcmp.eq.s32.totalorder %v328_v25, %v1244_v7  ;;  %v326_v29 = vadd.s32 32, %v1237_v1  ;;  %p987_p7 = pnand %p986_p1, %p980_p4 }
  0x5c   : > { %791 = vmatprep.subr.msk.mxu0 %vm387_vm8, %v1066_v10  ;;  %vm381_vm4 = vcmp.eq.s32.totalorder %v343_v26, %v1244_v7  ;;  %v341_v30 = vadd.s32 152, %v1237_v1  ;;  %vm365_vm5 = vcmp.eq.s32.totalorder %v327_v27, %v1244_v7  ;;  %v325_v31 = vadd.s32 24, %v1237_v1 }
  0x5d   : > { %792 = vmatpush3.msk.msra.mxu0 %vm371_vm9, %v1066_v10  ;;  %vm380_vm6 = vcmp.eq.s32.totalorder %v342_v28, %v1244_v7  ;;  %v340_v32 = vadd.s32 144, %v1237_v1  ;;  %vm364_vm7 = vcmp.eq.s32.totalorder %v326_v29, %v1244_v7  ;;  %v324_v33 = vadd.s32 16, %v1237_v1 }
  0x5e   : > { %793 = vmatprep.subr.msk.mxu0 %vm386_vm10, %v1066_v10  ;;  %vm379_vm8 = vcmp.eq.s32.totalorder %v341_v30, %v1244_v7  ;;  %v339_v34 = vadd.s32 136, %v1237_v1  ;;  %vm363_vm9 = vcmp.eq.s32.totalorder %v325_v31, %v1244_v7  ;;  %v323_v35 = vadd.s32 8, %v1237_v1 }
  0x5f   : > { %794 = vmatpush3.msk.msra.mxu0 %vm370_vm11, %v1066_v10  ;;  %vm378_vm10 = vcmp.eq.s32.totalorder %v340_v32, %v1244_v7  ;;  %v338_v36 = vadd.s32 128, %v1237_v1  ;;  %vm362_vm11 = vcmp.eq.s32.totalorder %v324_v33, %v1244_v7  ;;  %v556_v51 = vsub.s32 %v553_v50, %v1237_v1 }
  0x60   : > { %795 = vmatprep.subr.msk.mxu0 %vm385_vm12, %v1066_v10  ;;  %vm377_vm12 = vcmp.eq.s32.totalorder %v339_v34, %v1244_v7 }
  0x61   : > { %796 = vmatpush3.msk.msra.mxu0 %vm369_vm13, %v1066_v10  ;;  %vm361_vm13 = vcmp.eq.s32.totalorder %v323_v35, %v1244_v7 }
  0x62   : > { %797 = vmatprep.subr.msk.mxu0 %vm384_vm14, %v1066_v10  ;;  %vm376_vm14 = vcmp.eq.s32.totalorder %v338_v36, %v1244_v7 }
  0x63   : > { %798 = vmatpush3.msk.msra.mxu0 %vm368_vm15, %v1066_v10  ;;  %vm360_vm15 = vcmp.eq.s32.totalorder %v1237_v1, %v1244_v7 }
  0x64   : > { %799 = vmatprep.subr.msk.mxu0 %vm383_vm0, %v1066_v10  ;;  %vm316_vm0 = vcmask 60416  }
  0x65   : > { %800 = vmatpush3.msk.msra.mxu0 %vm367_vm1, %v1066_v10  ;;  %317 = vst.msk [vmem:[#allocation2] sm:$0xf] %vm316_vm0, %v1067_v37  ;;  %vm559_vm1 = vcmask 24576  }
  0x66   : > { %801 = vmatprep.subr.msk.mxu0 %vm382_vm2, %v1066_v10 }
  0x67   : > { %802 = vmatpush3.msk.msra.mxu0 %vm366_vm3, %v1066_v10 }
  0x68   : > { %803 = vmatprep.subr.msk.mxu0 %vm381_vm4, %v1066_v10 }
  0x69   : > { %804 = vmatpush3.msk.msra.mxu0 %vm365_vm5, %v1066_v10 }
  0x6a   : > { %805 = vmatprep.subr.msk.mxu0 %vm380_vm6, %v1066_v10 }
  0x6b   : > { %806 = vmatpush3.msk.msra.mxu0 %vm364_vm7, %v1066_v10 }
  0x6c   : > { %807 = vmatprep.subr.msk.mxu0 %vm379_vm8, %v1066_v10  ;;  %v529_v40 = vld [vmem:[#allocation2] sm:$0xf] }
  0x6d   : > { %808 = vmatpush3.msk.msra.mxu0 %vm363_vm9, %v1066_v10 }
  0x6e   : > { %809 = vmatprep.subr.msk.mxu0 %vm378_vm10, %v1066_v10 }
  0x6f   : > { %810 = vmatpush3.msk.msra.mxu0 %vm362_vm11, %v1066_v10 }
  0x70   : > { %811 = vmatprep.subr.msk.mxu0 %vm377_vm12, %v1066_v10 }
  0x71   : > { %812 = vmatpush3.msk.msra.mxu0 %vm361_vm13, %v1066_v10 }
  0x72   : > { %813 = vmatprep.subr.msk.mxu0 %vm376_vm14, %v1066_v10 }
  0x73   : > { %814 = vmatpush3.msk.msra.mxu0 %vm360_vm15, %v1066_v10 }
  0x74   : > { %524 = vmatmul.mubr.f32.vlgmr.msra.gmra.mxu0 %v1276_v19 }
 0x134   : > { %v815_v38 = vpop.f32.mrf.mxu0 }
 0x136   : > { %v816_v39 = vpop.f32.mrf.mxu0 }
 0x137   : > { %v817_v41 = vadd.f32 %v816_v39, %v815_v38 }
 0x139   : > { %v530_v42 = vadd.f32 %v817_v41, %v529_v40 }
 0x13b   : > { %532 = vst.msk [vmem:[#allocation2] sm:$0xf] %vm316_vm0, %v530_v42 }
 0x142   : > { %v538_v45 = vld [vmem:[#allocation2] sm:$0xf] }
 0x143   : > { %v539_v46 = vsub.f32 %v538_v45, %v537_v43 }
 0x145   : > { %v546_v47 = vmul.f32 %v778_v44, %v539_v46 }
 0x147   : > { %v547_v48 = vand.u32 2147483647, %v546_v47 }
 0x149   : > { %v548_v49 = vsel %vm316_vm0, %v547_v48, 0.0 }
 0x14a   : > { %549 = vadd.xlane.f32.xlu0 %v548_v49 }
 0x1d3   : > { %v550_v52 = vpop.xlane.xlu0 %549 }
 0x1d4   : > { %v557_v53 = vrot.slane %v550_v52, %v556_v51 }
 0x1d6   : > { %560 = vst.msk [vmem:[%s307_s24] sm:$0x1] %vm559_vm1, %v557_v53 }
 0x1d7   : > { %990 = shalt.err (!%p987_p7)
}
 0x1d8   : > { %s991_s14 = scalar_lea.hbm %s572_s13, 16  ;;  %s995_s21 = scalar_lea.hbm %s1399_s4, 32 }
 0x1d9   : > { %p992_p10 = scmp.ne.s32.totalorder %s572_s13, %s991_s14  ;;  %p996_p8 = scmp.lt.s32.totalorder %s572_s13, %s1399_s4 }
 0x1da   : > { %p997_p0 = scmp.lt.s32.totalorder %s995_s21, %s991_s14 }
 0x1db   : > { %p993_p13 = pnand %p992_p10, %p1149_p9 }
 0x1dc   : > { %p998_p2 = por %p997_p0, %p996_p8 }
 0x1dd   : > { %p994_p3 = pneg %p993_p13 }
 0x1df   : > { %p999_p12 = pnand %p998_p2, %p994_p3 }
 0x1e1   : > { %1002 = shalt.err (!%p999_p12)
}
 0x1e2   : > { %824 = dma.vmem_to_hbm [thread:$0]  (%p1149_p9), %s575_s10, 16, %s572_s13, %s562_s22  }
 0x1e3 PF: > { %s586_s8 = sand.u32 1, %s1041_s15   ;;  %p1411_p4 = scmp.ge.s32.totalorder %s1061_s20, 2 }
 0x1e4   : > { %s587_s9 = scalar_lea.sflag [#allocation5], %s586_s8 }
 0x1e5   : > { %p837_p5 = pnand %p1411_p4, %p1156_p11 }
 0x1e7   : > { %p838_p6 = pneg %p837_p5 }
 0x1e9   : > { %1036 = dma.done.wait (%p838_p6), %s587_s9, 16  }
 0x1ea   : > { %1038 = vsyncadd (%p838_p6), %s587_s9, 4294967280  ;;  %s23_s20 = sadd.s32 1, %s1061_s20   ;;  %s1412_s11 = sld [smem:[#allocation14_spill]] }
 0x1eb   : > { %p20_p1 = scmp.ge.s32.totalorder %s23_s20, 4   ;;  %s1413_s28 = sld [smem:[#allocation13_spill]] }
 0x1ec   : > { %s1414_s15 = smov %s1045_s16  ;;  %s1415_s16 = smov %s1049_s17 }
 0x1ed   : > { %s1417_s18 = smov %s1057_s19  ;;  %22 = sbr.rel (!%p20_p1) target bundleno = 10 (0xa), region = 116 }
 0x1f0   : > { %s1416_s17 = smov %s1412_s11 }
 0x1f1   : > { %s1418_s19 = smov %s1413_s28 }
 0x1f2   :  { %591 = vsyncpa [#allocation4], 1 }
 0x1f3   :  { %593 = vsyncpa [#allocation4 + $0x1], 1 }
 0x1f4   :  { %594 = vsyncpa [#allocation7], 1 }
 0x1f5   :  { %596 = vsyncpa [#allocation7 + $0x1], 1 }
 0x1f6   :  { %597 = vsyncpa [#allocation5], 1 }
 0x1f7   :  { %599 = vsyncpa [#allocation5 + $0x1], 1 }

</bundles_post_ra>
